<compile_context>
chip_gen: v5e
topology: v5e:2x2
jax: 0.10.0
libtpu: 0.0.40
codegen_flags: <defaults>
</compile_context>

<pallas_src>
import numpy as np
import jax
import jax.numpy as jnp
from jax.experimental import pallas as pl
from jax.experimental.pallas import tpu as pltpu


def _round_up(n, m):
    return (n + m - 1) // m * m


# ---------------------------------------------------------------------------
# Pallas kernel: one lane-dense batch tile of the full forward pass.
# Everything is "batch on lanes": x^T [S, TB], task_id [1, TB], y [1, TB].
# ---------------------------------------------------------------------------
def _rrnet_kernel(task_id_ref, xt_ref, w1_ref, w2_ref, hd_ref, y_ref):
    S = xt_ref.shape[0]
    H1 = w1_ref.shape[0]
    F = w2_ref.shape[0]

    xt = xt_ref[...].astype(jnp.float32)            # [S, TB]  (x may be bf16 in HBM)

    # Packed transposed weights: last column of each matrix is the bias.
    w1 = w1_ref[:, :S]                              # [H1, S]
    b1 = w1_ref[:, S:S + 1]                         # [H1, 1]
    w2 = w2_ref[:, :H1]                             # [F,  H1]
    b2 = w2_ref[:, H1:H1 + 1]                       # [F,  1]
    wh = hd_ref[:, :F]                              # [n_tasks, F]
    bh = hd_ref[:, F:F + 1]                         # [n_tasks, 1]

    # FCBody in transposed orientation: h = relu(W^T @ x + b), all f32.
    h1 = jnp.maximum(jnp.dot(w1, xt, preferred_element_type=jnp.float32) + b1, 0.0)
    h2 = jnp.maximum(jnp.dot(w2, h1, preferred_element_type=jnp.float32) + b2, 0.0)

    # MultiLinear head: one MXU matmul against ALL task heads -> [n_tasks, TB],
    # then per-column task-row selection via sublane iota-compare + sublane sum.
    scores = jnp.dot(wh, h2, preferred_element_type=jnp.float32) + bh   # [n_tasks, TB]
    tid = task_id_ref[...]                                              # [1, TB] int32
    row = jax.lax.broadcasted_iota(jnp.int32, scores.shape, 0)
    # Note: out-of-range / negative task_id silently yields y = 0 (documented).
    sel = jnp.where(row == tid, scores, 0.0)
    y_ref[...] = jnp.sum(sel, axis=0, keepdims=True)                    # [1, TB]


# ---------------------------------------------------------------------------
# Wrapper: lane-dense, batch-tiled pallas_call; weights resident via constant
# index maps; >= 2 batch tiles for v7x megacore.
# ---------------------------------------------------------------------------
def rrnet_forward(x, task_id, packed_params, *, block_b=16384):
    """x: [B, state_dim] (f32 or bf16), task_id: [B] or [B, 1] int.

    packed_params = (w1t [H1, S+1], w2t [F, H1+1], headt [n_tasks, F+1]) --
    transposed weights with the bias packed as the last column (see pack_params).
    Returns y: [B, 1] f32.
    """
    w1t, w2t, hdt = packed_params
    B, S = x.shape

    # One-time layout plumbing: put the batch on the lane dimension.
    xt = x.T                                              # [S, B]
    tid = jnp.asarray(task_id, jnp.int32).reshape(1, B)   # [1, B]

    # Lane-aligned tile; always form >= 2 tiles so both v7x TensorCores get work
    # (harmless extra padded tile on single-core v5e / v6e).
    block_b = _round_up(max(block_b, 128), 128)
    TB = max(128, min(block_b, _round_up(pl.cdiv(B, 2), 128)))
    Bp = max(_round_up(B, TB), 2 * TB)
    if Bp != B:
        xt = jnp.pad(xt, ((0, 0), (0, Bp - B)))
        tid = jnp.pad(tid, ((0, 0), (0, Bp - B)))
    grid = (Bp // TB,)

    const = lambda i: (0, 0)   # weights: fetched once, VMEM-resident across tiles
    y = pl.pallas_call(
        _rrnet_kernel,
        out_shape=jax.ShapeDtypeStruct((1, Bp), jnp.float32),
        grid=grid,
        in_specs=[
            pl.BlockSpec((1, TB), lambda i: (0, i)),    # task_id tile (lane-dense)
            pl.BlockSpec((S, TB), lambda i: (0, i)),    # x^T tile (lane-dense, pipelined)
            pl.BlockSpec(w1t.shape, const),             # packed layer-1 weights+bias
            pl.BlockSpec(w2t.shape, const),             # packed layer-2 weights+bias
            pl.BlockSpec(hdt.shape, const),             # packed multi-task head
        ],
        out_specs=pl.BlockSpec((1, TB), lambda i: (0, i)),  # y tile (unmasked lane-dense vst)
        compiler_params=pltpu.CompilerParams(
            dimension_semantics=("parallel",),          # megacore split on v7x
            vmem_limit_bytes=32 * 1024 * 1024),
    )(tid, xt, w1t, w2t, hdt)
    return y[0, :B].reshape(B, 1)


# ---------------------------------------------------------------------------
# Deterministic parameter construction (synthetic init, no checkpoint load)
# ---------------------------------------------------------------------------
def init_params(key, state_dim, hidden1, hidden2, n_tasks):
    """Natural-orientation parameters (mirror the PyTorch module layout)."""
    k1, k2, k3, k4, k5, k6 = jax.random.split(key, 6)
    w1 = jax.random.normal(k1, (state_dim, hidden1), jnp.float32) / np.sqrt(state_dim)
    b1 = 0.1 * jax.random.normal(k4, (hidden1,), jnp.float32)
    w2 = jax.random.normal(k2, (hidden1, hidden2), jnp.float32) / np.sqrt(hidden1)
    b2 = 0.1 * jax.random.normal(k5, (hidden2,), jnp.float32)
    # MultiLinear: weight [n_tasks, feature_dim, 1] stored as [n_tasks, feature_dim],
    # bias [n_tasks, 1, 1] stored as [n_tasks].
    wh = jax.random.normal(k3, (n_tasks, hidden2), jnp.float32) / np.sqrt(hidden2)
    bh = 0.1 * jax.random.normal(k6, (n_tasks,), jnp.float32)
    return (w1, b1, w2, b2, wh, bh)


def pack_params(params):
    """One-time layout plumbing: transpose weights, pack bias as last column."""
    w1, b1, w2, b2, wh, bh = params
    w1t = jnp.concatenate([w1.T, b1[:, None]], axis=1)   # [H1, S+1]
    w2t = jnp.concatenate([w2.T, b2[:, None]], axis=1)   # [F,  H1+1]
    hdt = jnp.concatenate([wh, bh[:, None]], axis=1)     # [n_tasks, F+1]
    return (w1t, w2t, hdt)


def rrnet_reference(x, task_id, params):
    """Pure-JAX reference of the PyTorch forward (per-sample head gather)."""
    w1, b1, w2, b2, wh, bh = params
    xf = x.astype(jnp.float32)
    h1 = jnp.maximum(xf @ w1 + b1, 0.0)
    h2 = jnp.maximum(h1 @ w2 + b2, 0.0)
    tid = jnp.asarray(task_id, jnp.int32).reshape(-1)
    w_sel = wh[tid]                                      # [B, F]
    b_sel = bh[tid]                                      # [B]
    return (jnp.sum(h2 * w_sel, axis=-1) + b_sel)[:, None]


if __name__ == "__main__":
    STATE_DIM, H1, H2, N_TASKS = 16, 32, 32, 4
    key = jax.random.PRNGKey(0)
    kp, kx1, kt1, kx2, kt2, kx3, kt3 = jax.random.split(key, 7)
    params = init_params(kp, STATE_DIM, H1, H2, N_TASKS)
    packed = pack_params(params)

    # --- tiny batch: padded up to 2 lane-aligned tiles, exact f32 path --------
    B1 = 8
    x1 = jax.random.normal(kx1, (B1, STATE_DIM), jnp.float32)
    t1 = jax.random.randint(kt1, (B1, 1), 0, N_TASKS, jnp.int32)
    y1 = jax.block_until_ready(rrnet_forward(x1, t1, packed))
    np.testing.assert_allclose(np.asarray(y1),
                               np.asarray(rrnet_reference(x1, t1, params)),
                               rtol=1e-5, atol=1e-5)

    # --- multi-tile grid with a non-128-multiple batch (tests tail padding) ---
    B2 = 300
    x2 = jax.random.normal(kx2, (B2, STATE_DIM), jnp.float32)
    t2 = jax.random.randint(kt2, (B2, 1), 0, N_TASKS, jnp.int32)
    y2 = jax.block_until_ready(rrnet_forward(x2, t2, packed, block_b=128))
    np.testing.assert_allclose(np.asarray(y2),
                               np.asarray(rrnet_reference(x2, t2, params)),
                               rtol=1e-5, atol=1e-5)

    # --- bf16 x from HBM (halves the dominant x DMA; compute stays f32) -------
    B3 = 256
    x3 = jax.random.normal(kx3, (B3, STATE_DIM), jnp.float32).astype(jnp.bfloat16)
    t3 = jax.random.randint(kt3, (B3, 1), 0, N_TASKS, jnp.int32)
    y3 = jax.block_until_ready(rrnet_forward(x3, t3, packed, block_b=128))
    np.testing.assert_allclose(np.asarray(y3),
                               np.asarray(rrnet_reference(x3, t3, params)),
                               rtol=1e-5, atol=1e-5)

    print("KERNEL_OK")
</pallas_src>

<mosaic_0001>
module attributes {stable_mosaic.version = 11 : i64} {
  func.func @_rrnet_kernel(%arg0: i32, %arg1: memref<1x128xi32, #tpu.memory_space<vmem>>, %arg2: memref<16x128xf32, #tpu.memory_space<vmem>>, %arg3: memref<32x17xf32, #tpu.memory_space<vmem>>, %arg4: memref<32x33xf32, #tpu.memory_space<vmem>>, %arg5: memref<4x33xf32, #tpu.memory_space<vmem>>, %arg6: memref<1x128xf32, #tpu.memory_space<vmem>>) attributes {dimension_semantics = [#tpu.dimension_semantics<parallel>], iteration_bounds = array<i64: 2>, scalar_prefetch = 0 : i64, scratch_operands = 0 : i64, tpu.core_type = #tpu.core_type<tc>, window_params = [{transform_indices = @transform_0, window_bounds = array<i64: 1, 128>}, {transform_indices = @transform_1, window_bounds = array<i64: 16, 128>}, {pipeline_mode = #tpu.pipeline_mode<synchronous>, transform_indices = @transform_2, window_bounds = array<i64: 32, 17>}, {pipeline_mode = #tpu.pipeline_mode<synchronous>, transform_indices = @transform_3, window_bounds = array<i64: 32, 33>}, {pipeline_mode = #tpu.pipeline_mode<synchronous>, transform_indices = @transform_4, window_bounds = array<i64: 4, 33>}, {transform_indices = @transform_5, window_bounds = array<i64: 1, 128>}]} {
    %c0 = arith.constant 0 : index
    %c0_0 = arith.constant 0 : index
    %0 = vector.load %arg2[%c0, %c0_0] : memref<16x128xf32, #tpu.memory_space<vmem>>, vector<16x128xf32>
    %c0_1 = arith.constant 0 : index
    %c0_2 = arith.constant 0 : index
    %1 = vector.load %arg3[%c0_1, %c0_2] : memref<32x17xf32, #tpu.memory_space<vmem>>, vector<32x16xf32>
    %c0_3 = arith.constant 0 : index
    %c16 = arith.constant 16 : index
    %2 = vector.load %arg3[%c0_3, %c16] : memref<32x17xf32, #tpu.memory_space<vmem>>, vector<32x1xf32>
    %c0_4 = arith.constant 0 : index
    %c0_5 = arith.constant 0 : index
    %3 = vector.load %arg4[%c0_4, %c0_5] : memref<32x33xf32, #tpu.memory_space<vmem>>, vector<32x32xf32>
    %c0_6 = arith.constant 0 : index
    %c32 = arith.constant 32 : index
    %4 = vector.load %arg4[%c0_6, %c32] : memref<32x33xf32, #tpu.memory_space<vmem>>, vector<32x1xf32>
    %c0_7 = arith.constant 0 : index
    %c0_8 = arith.constant 0 : index
    %5 = vector.load %arg5[%c0_7, %c0_8] : memref<4x33xf32, #tpu.memory_space<vmem>>, vector<4x32xf32>
    %c0_9 = arith.constant 0 : index
    %c32_10 = arith.constant 32 : index
    %6 = vector.load %arg5[%c0_9, %c32_10] : memref<4x33xf32, #tpu.memory_space<vmem>>, vector<4x1xf32>
    %cst = arith.constant dense<0.000000e+00> : vector<32x128xf32>
    %7 = tpu.matmul %1, %0, %cst {dimension_numbers = #tpu.dot_dimension_numbers<[1], [0], [0], [1], [0, 0, 1, 1], [], []>} : vector<32x16xf32>, vector<16x128xf32>, vector<32x128xf32> -> vector<32x128xf32>
    %8 = vector.broadcast %2 : vector<32x1xf32> to vector<32x128xf32>
    %9 = arith.addf %7, %8 : vector<32x128xf32>
    %cst_11 = arith.constant 0.000000e+00 : f32
    %10 = vector.broadcast %cst_11 : f32 to vector<32x128xf32>
    %11 = arith.maximumf %9, %10 : vector<32x128xf32>
    %cst_12 = arith.constant dense<0.000000e+00> : vector<32x128xf32>
    %12 = tpu.matmul %3, %11, %cst_12 {dimension_numbers = #tpu.dot_dimension_numbers<[1], [0], [0], [1], [0, 0, 1, 1], [], []>} : vector<32x32xf32>, vector<32x128xf32>, vector<32x128xf32> -> vector<32x128xf32>
    %13 = vector.broadcast %4 : vector<32x1xf32> to vector<32x128xf32>
    %14 = arith.addf %12, %13 : vector<32x128xf32>
    %cst_13 = arith.constant 0.000000e+00 : f32
    %15 = vector.broadcast %cst_13 : f32 to vector<32x128xf32>
    %16 = arith.maximumf %14, %15 : vector<32x128xf32>
    %cst_14 = arith.constant dense<0.000000e+00> : vector<4x128xf32>
    %17 = tpu.matmul %5, %16, %cst_14 {dimension_numbers = #tpu.dot_dimension_numbers<[1], [0], [0], [1], [0, 0, 1, 1], [], []>} : vector<4x32xf32>, vector<32x128xf32>, vector<4x128xf32> -> vector<4x128xf32>
    %18 = vector.broadcast %6 : vector<4x1xf32> to vector<4x128xf32>
    %19 = arith.addf %17, %18 : vector<4x128xf32>
    %c0_15 = arith.constant 0 : index
    %c0_16 = arith.constant 0 : index
    %20 = vector.load %arg1[%c0_15, %c0_16] : memref<1x128xi32, #tpu.memory_space<vmem>>, vector<1x128xi32>
    %21 = tpu.iota {dimensions = array<i32: 0>} : vector<4x128xi32>
    %22 = vector.broadcast %20 : vector<1x128xi32> to vector<4x128xi32>
    %23 = arith.cmpi eq, %21, %22 : vector<4x128xi32>
    %cst_17 = arith.constant 0.000000e+00 : f32
    %24 = vector.broadcast %cst_17 : f32 to vector<4x128xf32>
    %25 = arith.select %23, %19, %24 : vector<4x128xi1>, vector<4x128xf32>
    %cst_18 = arith.constant dense<0.000000e+00> : vector<128xf32>
    %26 = vector.multi_reduction <add>, %25, %cst_18 [0] : vector<4x128xf32> to vector<128xf32>
    %27 = vector.shape_cast %26 : vector<128xf32> to vector<1x128xf32>
    %c0_19 = arith.constant 0 : index
    %c0_20 = arith.constant 0 : index
    %28 = vector.load %arg6[%c0_19, %c0_20] : memref<1x128xf32, #tpu.memory_space<vmem>>, vector<1x128xf32>
    tpu.vector_store %arg6[%c0_19, %c0_20], %27 {strides = array<i32>} : memref<1x128xf32, #tpu.memory_space<vmem>>, vector<1x128xf32>,
    return
  }
  func.func @transform_0(%arg0: i32) -> (i32, i32) {
    %c0_i32 = arith.constant 0 : i32
    %c0_i32_0 = arith.constant 0 : i32
    return %c0_i32, %arg0 : i32, i32
  }
  func.func @transform_1(%arg0: i32) -> (i32, i32) {
    %c0_i32 = arith.constant 0 : i32
    %c0_i32_0 = arith.constant 0 : i32
    return %c0_i32, %arg0 : i32, i32
  }
  func.func @transform_2(%arg0: i32) -> (i32, i32) {
    %c0_i32 = arith.constant 0 : i32
    %c0_i32_0 = arith.constant 0 : i32
    %c0_i32_1 = arith.constant 0 : i32
    return %c0_i32, %c0_i32_0 : i32, i32
  }
  func.func @transform_3(%arg0: i32) -> (i32, i32) {
    %c0_i32 = arith.constant 0 : i32
    %c0_i32_0 = arith.constant 0 : i32
    %c0_i32_1 = arith.constant 0 : i32
    return %c0_i32, %c0_i32_0 : i32, i32
  }
  func.func @transform_4(%arg0: i32) -> (i32, i32) {
    %c0_i32 = arith.constant 0 : i32
    %c0_i32_0 = arith.constant 0 : i32
    %c0_i32_1 = arith.constant 0 : i32
    return %c0_i32, %c0_i32_0 : i32, i32
  }
  func.func @transform_5(%arg0: i32) -> (i32, i32) {
    %c0_i32 = arith.constant 0 : i32
    %c0_i32_0 = arith.constant 0 : i32
    return %c0_i32, %arg0 : i32, i32
  }
}

</mosaic_0001>

<bundles_post_ra>
// kernel: tpu_custom_call.1
= control target key start
LH: loop header
LB: loop body
LE: loop exit
PB: predicated region body
PF: predicated region fallthrough
CT: control target
= control target key end

     0   :  { %10 = vsyncpa [#allocation4], 0  ;;  %s931_s0 = inlined_call_operand.vmem [shape: s32[1,256], index: 0, kind: input, shape index: {}]   ;;  %s932_s1 = inlined_call_operand.vmem [shape: f32[16,256], index: 1, kind: input, shape index: {}]   ;;  %s933_s2 = inlined_call_operand.vmem [shape: f32[32,17], index: 2, kind: input, shape index: {}]   ;;  %s934_s3 = inlined_call_operand.hbm [shape: f32[32,33], index: 3, kind: input, shape index: {}]   ;;  %s935_s4 = inlined_call_operand.vmem [shape: f32[4,33], index: 4, kind: input, shape index: {}]   ;;  %s936_s5 = inlined_call_operand.hbm [shape: f32[1,256], index: 5, kind: output, shape index: {}]  }
   0x1   :  { %11 = vsyncpa [#allocation5], 0 }
   0x2   :  { %13 = vsyncpa [#allocation5 + $0x1], 0  ;;  %s787_s18 = smov 0   ;;  %s789_s19 = smov 0  }
   0x3   :  { %s791_s20 = smov 0   ;;  %s793_s21 = smov 0  }
   0x4 LB: > { %s808_s22 = sadd.s32 4294967295, %s750_s21   ;;  %s564_s23 = sadd.s32 4294967294, %s750_s21   ;;  %s750_s21 = sphi %s793_s21, %s944_s21   ;;  %s746_s20 = sphi %s791_s20, %s943_s20   ;;  %s742_s19 = sphi %s789_s19, %s942_s19   ;;  %s738_s18 = sphi %s787_s18, %s941_s18  }
   0x5   : > { %s812_s24 = sadd.s32 1, %s750_s21   ;;  %s52_s25 = sadd.s32 1, %s746_s20 }
   0x6   : > { %s49_s26 = ssub.s32 %s750_s21, %s812_s24  ;;  %p59_p0 = scmp.ne.s32.totalorder %s746_s20, %s742_s19 }
   0x7   : > { %p50_p1 = scmp.eq.s32.totalorder %s49_s26, 0  ;;  %p60_p2 = scmp.eq.s32.totalorder %s750_s21, 0 }
   0x8   : > { %p152_p3 = scmp.eq.s32.totalorder %s808_s22, 1  ;;  %p157_p4 = scmp.ne.s32.totalorder %s742_s19, %s738_s18 }
   0x9   : > { %s824_s27 = scalar_select %p50_p1, %s746_s20, %s52_s25  }
   0xa   : > { %p826_p5 = por %p60_p2, %p59_p0  ;;  %p830_p6 = por %p152_p3, %p59_p0 }
   0xb   : > { %p158_p7 = scmp.eq.s32.totalorder %s564_s23, 1  ;;  %p565_p8 = scmp.ge.s32.totalorder %s750_s21, 1 }
   0xc   : > { %p165_p9 = scmp.lt.s32.totalorder %s750_s21, 3  ;;  %p608_p11 = scmp.eq.s32.totalorder %s808_s22, 0 }
   0xd   : > { %p836_p10 = por %p158_p7, %p157_p4  ;;  %s179_s9 = sshll.u32 %s934_s3, 4  ;;  %s180_s9 = int_to_ptr.hbm [resolvable:$true] %s179_s9 }
   0xe   : > { %p841_p12 = pnand %p565_p8, %p165_p9  ;;  %s752_s10 = smov [#allocation3]  }
   0xf   : > { %s181_s11 = sshll.u32 %s752_s10, 4  ;;  %s753_s12 = smov 128   ;;  %s182_s11 = int_to_ptr.vmem [resolvable:$true] %s181_s11 }
  0x10   : > { %p600_p13 = pneg %p841_p12  ;;  %s754_s13 = smov 8  }
  0x11   : > { %p567_p1 = scmp.ge.s32.totalorder %s750_s21, 2 }
  0x12   : > { %p601_p0 = pnand %p608_p11, %p600_p13 }
  0x13   : > { %194 = sbr.rel (%p567_p1) target bundleno = 30 (0x1e), region = 28 }
  0x14   : > { %603 = dma.hbm_to_vmem [thread:$0]  (!%p601_p0), %s180_s9, 512, %s182_s11, [#allocation4], %s753_s12, %s753_s12, %s754_s13  }
  0x18   : > { %203 = sbr.rel (!%p826_p5) target bundleno = 30 (0x1e), region = 36  ;;  %s205_s14 = sand.u32 (%p826_p5), 1, %s746_s20  }
  0x19   : > { %s569_s15 = sshll.u32 (%p826_p5), %s750_s21, 3  ;;  %s568_s16 = sshll.u32 (%p826_p5), %s205_s14, 4 }
  0x1a   : > { %s209_s25 = scalar_lea.vmem (%p826_p5), %s932_s1, %s569_s15  ;;  %s207_s26 = scalar_lea.vmem (%p826_p5), [#allocation2], %s568_s16 }
  0x1b   : > { %v240_v0 = vld [vmem:[%s209_s25] sm:$0xff] (%p826_p5)  ;;  %v242_v1 = vld [vmem:[%s209_s25 + $0x10] sm:$0xff] (%p826_p5) }
  0x1c   : > { %241 = vst [vmem:[%s207_s26] sm:$0xff] (%p826_p5), %v240_v0 }
  0x1d   : > { %243 = vst [vmem:[%s207_s26 + $0x8] sm:$0xff] %v242_v1 }
  0x1e PF: > { %252 = sbr.rel (%p841_p12) target bundleno = 495 (0x1ef), region = 74  ;;  %s865_s28 = sand.u32 (!%p841_p12), 1, %s742_s19  }
  0x1f   : > { %s571_s7 = sshll.u32 (!%p841_p12), %s865_s28, 4 }
  0x20   : > { %s257_s8 = scalar_lea.vmem (!%p841_p12), [#allocation2], %s571_s7 }
  0x23   : > { %729 = dma.done.wait (%p608_p11), [#allocation4], 512  }
  0x24   : > { %731 = vsyncadd (%p608_p11), [#allocation4], 4294966784  ;;  %v755_v2 = vmov 16   ;;  %v293_v3 = vld [vmem:[%s257_s8 + $0x8] sm:$0xff]  ;;  %v292_v4 = vld [vmem:[%s257_s8] sm:$0xff]  ;;  %vm323_vm0 = vcmask 130048   ;;  %v455_v47 = vlaneseq  ;;  %s478_s9 = scalar_lea.hbm %s936_s5, %s808_s22 }
  0x25   : > { %649 = vset.pattern.permute.xlu1 %v755_v2  ;;  %648 = vset.pattern.permute.xlu0 %v755_v2  ;;  %v294_v5 = vld [vmem:[%s933_s2] sm:$0xff]  ;;  %v295_v6 = vld [vmem:[%s933_s2 + $0x8] sm:$0xff]  ;;  %v297_v7 = vld [vmem:[%s933_s2 + $0x18] sm:$0xff]  ;;  %v756_v14 = vmov 32   ;;  %vm385_vm1 = vcmask 261120   ;;  %p289_p2 = scmp.lt.s32.totalorder %s808_s22, 1 }
  0x26   : > { %346 = vmatpush.msra.mxu0 %v293_v3  ;;  %584 = vmatpush.msra.mxu1 %v293_v3  ;;  %v296_v8 = vld [vmem:[%s933_s2 + $0x10] sm:$0xff]  ;;  %v301_v16 = vld [vmem:[#allocation3 + $0x18] sm:$0xff]  ;;  %v299_v17 = vld [vmem:[#allocation3 + $0x8] sm:$0xff]  ;;  %v456_v48 = vshrl.u32 %v455_v47, 7  ;;  %vm460_vm3 = vcmask 1043456   ;;  %s288_s10 = scalar_lea.vmem [#allocation6], %s865_s28 }
  0x27   : > { %310 = vperm.xlu1 %649, %v295_v6   ;;  %320 = vperm.xlu0 %648, %v297_v7   ;;  %v298_v18 = vld [vmem:[#allocation3] sm:$0xff]  ;;  %v300_v20 = vld [vmem:[#allocation3 + $0x10] sm:$0xff]  ;;  %s290_s23 = scalar_select %p289_p2, %s808_s22, 1 }
  0x28   : > { %347 = vmatpush.msra.mxu0 %v292_v4  ;;  %585 = vmatpush.msra.mxu1 %v292_v4  ;;  %v302_v28 = vld [vmem:[%s935_s4] sm:$0xf]  ;;  %s480_s11 = sshll.u32 %s288_s10, 4  ;;  %s482_s12 = sshll.u32 %s478_s9, 4  ;;  %s481_s11 = int_to_ptr.vmem [resolvable:$true] %s480_s11  ;;  %s483_s12 = int_to_ptr.hbm [resolvable:$true] %s482_s12 }
  0x29   : > { %573 = vmatmul.msk.f32.vlgmr.msra.gmra.mxu0 %vm323_vm0, %v294_v5  ;;  %576 = vmatmul.msk.f32.vlgmr.msra.gmra.mxu1 %vm323_vm0, %v297_v7  ;;  %s291_s7 = scalar_lea.vmem %s931_s0, %s290_s23  ;;  %s470_s13 = scalar_lea.sflag [#allocation5], %s865_s28 }
  0x2a   : > { %650 = vset.pattern.permute.xlu2 %v756_v14  ;;  %v653_v49 = vld [vmem:[%s291_s7] ss:$0 sm:$0xff]  ;;  %s698_s14 = sshra.s32 %s483_s12, 4  ;;  %s704_s22 = scalar_lea.hbm %s936_s5, 2  ;;  %s699_s14 = int_to_ptr.hbm [resolvable:$true] %s698_s14 }
  0x2b   : > { %382 = vperm.xlu2 %650, %v301_v16   ;;  %vm458_vm2 = vcmp.eq.s32.totalorder %v456_v48, %v653_v49  ;;  %s700_s15 = scalar_lea.hbm %s699_s14, 1  ;;  %p705_p7 = scmp.lt.s32.totalorder %s699_s14, %s936_s5 }
  0x2c   : > { %p701_p3 = scmp.ne.s32.totalorder %s699_s14, %s700_s15  ;;  %p706_p8 = scmp.lt.s32.totalorder %s704_s22, %s700_s15 }
  0x2e   : > { %p702_p4 = pnand %p701_p3, %p830_p6  ;;  %p707_p9 = por %p706_p8, %p705_p7 }
  0x2f   : > { %305 = vperm.xlu1 %649, %v294_v5   ;;  %315 = vperm.xlu0 %648, %v296_v8  }
  0x30   : > { %p703_p5 = pneg %p702_p4 }
  0x31   : > { %574 = vmatmul.msk.f32.gmra.mxu0 %vm323_vm0, %v295_v6 }
  0x32   : > { %p708_p11 = pnand %p707_p9, %p703_p5 }
  0x33   : > { %377 = vperm.xlu2 %650, %v300_v20  }
  0x37   : > { %651 = vset.pattern.permute.xlu0 %v756_v14  ;;  %652 = vset.pattern.permute.xlu1 %v756_v14 }
  0x38   : > { %372 = vperm.xlu0 %651, %v299_v17   ;;  %367 = vperm.xlu1 %652, %v298_v18  }
  0x39   : > { %575 = vmatmul.msk.f32.gmra.mxu0 %vm323_vm0, %v296_v8 }
  0x3b   : > { %429 = vperm.xlu2 %650, %v302_v28  }
  0x85   : > { %v383_v31 = vpop.permute.xlu2 %382 }
  0x8d   : > { %v378_v35 = vpop.permute.xlu2 %377 }
  0x95   : > { %v430_v50 = vpop.permute.xlu2 %429 }
  0x99   : > { %v321_v9 = vpop.permute.xlu0 %320  ;;  %v311_v15 = vpop.permute.xlu1 %310 }
  0xa1   : > { %v306_v21 = vpop.permute.xlu1 %305  ;;  %v316_v22 = vpop.permute.xlu0 %315 }
  0xa6   : > { %v349_v10 = vpop.f32.mrf.mxu0  ;;  %v358_v11 = vpop.f32.mrf.mxu1 }
  0xa7   : > { %v359_v12 = vadd.f32 %v358_v11, %v321_v9  ;;  %v350_v26 = vadd.f32 %v349_v10, %v306_v21 }
  0xa9   : > { %v364_v13 = vmax.f32 %v359_v12, 0.0  ;;  %v361_v30 = vmax.f32 %v350_v26, 0.0 }
  0xaa   : > { %v373_v33 = vpop.permute.xlu0 %372  ;;  %v368_v36 = vpop.permute.xlu1 %367 }
  0xab   : > { %406 = vmatpush.msrb.mxu1 %v364_v13  ;;  %586 = vmatpush.msra.mxu2 %v364_v13 }
  0xac   : > { %587 = vmatpush.msra.mxu3 %v364_v13 }
  0xae   : > { %v352_v19 = vpop.f32.mrf.mxu0 }
  0xaf   : > { %v353_v24 = vadd.f32 %v352_v19, %v311_v15 }
  0xb1   : > { %v362_v29 = vmax.f32 %v353_v24, 0.0 }
  0xb6   : > { %v355_v23 = vpop.f32.mrf.mxu0 }
  0xb7   : > { %v356_v25 = vadd.f32 %v355_v23, %v316_v22 }
  0xb9   : > { %v363_v27 = vmax.f32 %v356_v25, 0.0 }
  0xbb   : > { %407 = vmatpush.msrb.mxu1 %v363_v27  ;;  %588 = vmatpush.msra.mxu2 %v363_v27 }
  0xbc   : > { %589 = vmatpush.msra.mxu3 %v363_v27 }
  0xbd   : > { %408 = vmatpush.msrb.mxu1 %v362_v29  ;;  %590 = vmatpush.msra.mxu2 %v362_v29 }
  0xbe   : > { %591 = vmatpush.msra.mxu3 %v362_v29 }
  0xbf   : > { %409 = vmatpush.msrb.mxu1 %v361_v30  ;;  %592 = vmatpush.msra.mxu2 %v361_v30 }
  0xc0   : > { %593 = vmatpush.msra.mxu3 %v361_v30  ;;  %578 = vmatmul.msk.f32.vlgmr.msra.gmra.mxu2 %vm385_vm1, %v299_v17 }
  0xc1   : > { %579 = vmatmul.msk.f32.vlgmr.msra.gmra.mxu3 %vm385_vm1, %v300_v20  ;;  %577 = vmatmul.msk.f32.vlgmr.msrb.gmra.mxu1 %vm385_vm1, %v298_v18 }
  0xc9   : > { %580 = vmatmul.msk.f32.gmra.mxu3 %vm385_vm1, %v301_v16 }
 0x13e   : > { %v411_v38 = vpop.f32.mrf.mxu1 }
 0x13f   : > { %v412_v43 = vadd.f32 %v411_v38, %v368_v36 }
 0x141   : > { %v423_v46 = vmax.f32 %v412_v43, 0.0 }
 0x143   : > { %v414_v34 = vpop.f32.mrf.mxu2 }
 0x144   : > { %v417_v32 = vpop.f32.mrf.mxu3  ;;  %v415_v41 = vadd.f32 %v414_v34, %v373_v33 }
 0x145   : > { %v418_v39 = vadd.f32 %v417_v32, %v378_v35 }
 0x146   : > { %v424_v45 = vmax.f32 %v415_v41, 0.0 }
 0x147   : > { %v425_v44 = vmax.f32 %v418_v39, 0.0 }
 0x14c   : > { %v420_v37 = vpop.f32.mrf.mxu3 }
 0x14d   : > { %v421_v40 = vadd.f32 %v420_v37, %v383_v31 }
 0x14f   : > { %v426_v42 = vmax.f32 %v421_v40, 0.0 }
 0x151   : > { %446 = vmatpush.msrb.mxu2 %v426_v42 }
 0x153   : > { %447 = vmatpush.msrb.mxu2 %v425_v44 }
 0x155   : > { %448 = vmatpush.msrb.mxu2 %v424_v45 }
 0x157   : > { %449 = vmatpush.msrb.mxu2 %v423_v46 }
 0x158   : > { %581 = vmatmul.msk.f32.vlgmr.msrb.gmra.mxu2 %vm385_vm1, %v302_v28 }
 0x1db   : > { %v451_v51 = vpop.f32.mrf.mxu2 }
 0x1dc   : > { %v452_v52 = vadd.f32 %v451_v51, %v430_v50 }
 0x1de   : > { %v459_v53 = vsel %vm458_vm2, %v452_v52, 0.0 }
 0x1df   : > { %v461_v54 = vsel %vm460_vm3, %v459_v53, 0.0 }
 0x1e0   : > { %v462_v55 = vrot.slane %v461_v54, 4 }
 0x1e2   : > { %v463_v56 = vadd.f32 %v462_v55, %v461_v54 }
 0x1e4   : > { %v464_v57 = vrot.slane %v463_v56, 2 }
 0x1e6   : > { %v465_v58 = vadd.f32 %v464_v57, %v463_v56 }
 0x1e8   : > { %v466_v59 = vrot.slane %v465_v58, 1 }
 0x1ea   : > { %v467_v60 = vadd.f32 %v466_v59, %v465_v58 }
 0x1ec   : > { %468 = vst [vmem:[%s288_s10] sm:$0x1] %v467_v60 }
 0x1ed   : > { %711 = shalt.err (!%p708_p11)
}
 0x1ee   : > { %598 = dma.vmem_to_hbm [thread:$0]  (%p830_p6), %s481_s11, 16, %s483_s12, %s470_s13  }
 0x1ef PF: > { %s494_s28 = sand.u32 1, %s738_s18   ;;  %p605_p12 = pnand %p567_p1, %p836_p10 }
 0x1f0   : > { %s495_s26 = scalar_lea.sflag [#allocation5], %s494_s28 }
 0x1f1   : > { %p606_p13 = pneg %p605_p12 }
 0x1f3   : > { %733 = dma.done.wait (%p606_p13), %s495_s26, 16  }
 0x1f4   : > { %735 = vsyncadd (%p606_p13), %s495_s26, 4294967280  ;;  %p16_p0 = scmp.ge.s32.totalorder %s812_s24, 4   ;;  %s941_s18 = smov %s742_s19 }
 0x1f5   : > { %s942_s19 = smov %s746_s20  ;;  %s943_s20 = smov %s824_s27 }
 0x1f6   : > { %s944_s21 = smov %s812_s24  ;;  %18 = sbr.rel (!%p16_p0) target bundleno = 4 (0x4), region = 126 }
 0x1fb   :  { %500 = vsyncpa [#allocation4], 1 }
 0x1fc   :  { %502 = vsyncpa [#allocation4 + $0x1], 1 }
 0x1fd   :  { %503 = vsyncpa [#allocation5], 1 }
 0x1fe   :  { %505 = vsyncpa [#allocation5 + $0x1], 1 }

</bundles_post_ra>
